<compile_context>
chip_gen: v5e
topology: v5e:2x2
jax: 0.10.0
libtpu: 0.0.40
codegen_flags: <defaults>
</compile_context>

<pallas_src>
import math

import jax
import jax.numpy as jnp
from jax.experimental import pallas as pl
from jax.experimental.pallas import tpu as pltpu


_LANES = 1024                       # lane-dense width, multiple of 128
_TARGET_BLOCK_BYTES = 4 << 20       # ~4 MiB per array per grid step
_MAX_TILE_ROWS = 4096               # cap for very narrow dtypes (int8)
_MIN_PALLAS_ELEMS = 1 << 20         # below ~1M elems, fused XLA add wins


def _daf_add_kernel(x_ref, r_ref, o_ref):
    # Pure VPU elementwise add on the VMEM tile, in the promoted output dtype
    # (exact for ints, native bf16 add on v6e/v7x; Mosaic widens on v5e).
    o_ref[...] = x_ref[...].astype(o_ref.dtype) + r_ref[...].astype(o_ref.dtype)


def _pick_tile_rows(rows, max_item_bytes):
    """Bytes-based tile selection + guarantee >=2 grid steps for megacore."""
    tile_rows = _TARGET_BLOCK_BYTES // (_LANES * max_item_bytes)
    tile_rows = max(8, min(_MAX_TILE_ROWS, (tile_rows // 8) * 8))
    if rows <= tile_rows:
        if rows >= 16:
            # Split into two row-tiles (multiple of 8) so both v7x TensorCores
            # get work under dimension_semantics=("parallel",).
            half = -(-rows // 2)                # ceil(rows / 2)
            tile_rows = ((half + 7) // 8) * 8   # round up to sublane multiple
        else:
            tile_rows = rows                    # single full-extent block
    return tile_rows


def daf_forward(x, residual, *, min_pallas_elements=_MIN_PALLAS_ELEMS,
                donate_x=False):
    """Pallas implementation of DAF.forward: x + residual (exact semantics)."""
    assert x.shape == residual.shape, "DAF requires matching shapes"
    orig_shape = x.shape
    out_dtype = jnp.result_type(x.dtype, residual.dtype)
    total = math.prod(orig_shape) if orig_shape else 1

    # Fallback path: tiny tensors (dispatch overhead dominates) and totals that
    # are not a multiple of 1024 lanes. A fused XLA add is already at the HBM
    # roofline for these; padding/slicing/splitting would only add traffic.
    if total == 0 or total < min_pallas_elements or total % _LANES != 0:
        return (x + residual).astype(out_dtype)

    rows = total // _LANES
    x2 = x.reshape(rows, _LANES)            # contiguous reshape: free
    r2 = residual.reshape(rows, _LANES)

    max_item = max(x2.dtype.itemsize, r2.dtype.itemsize, out_dtype.itemsize)
    tile_rows = _pick_tile_rows(rows, max_item)

    grid = (pl.cdiv(rows, tile_rows),)
    block = (tile_rows, _LANES)

    # Optional in-place write into x's buffer. Only enable when the caller's x
    # is genuinely dead afterwards (e.g. under jit with donated args); otherwise
    # XLA inserts a defensive copy, which adds an extra HBM pass.
    aliases = {0: 0} if (donate_x and x2.dtype == out_dtype) else {}

    out = pl.pallas_call(
        _daf_add_kernel,
        out_shape=jax.ShapeDtypeStruct((rows, _LANES), out_dtype),
        grid_spec=pl.GridSpec(
            grid=grid,
            in_specs=[
                pl.BlockSpec(block, lambda i: (i, 0)),
                pl.BlockSpec(block, lambda i: (i, 0)),
            ],
            out_specs=pl.BlockSpec(block, lambda i: (i, 0)),
        ),
        compiler_params=pltpu.CompilerParams(
            # Row tiles are independent -> shard across both v7x TensorCores.
            dimension_semantics=("parallel",),
            # Explicit scoped-VMEM budget: ~24 MiB of double-buffered blocks in
            # the worst case + Mosaic scratch; fits v7x 64 MiB / v5e-v6e 128 MiB.
            vmem_limit_bytes=40 << 20,
        ),
        input_output_aliases=aliases,
    )(x2, r2)

    return out.reshape(orig_shape)


if __name__ == "__main__":
    key = jax.random.PRNGKey(0)
    k1, k2, k3, k4 = jax.random.split(key, 4)

    # 1) Small NCHW shape (batch=2, channels=4, spatial=16x16): 2048 elements,
    #    lane-aligned -> single full-extent block through the Pallas path.
    x = jax.random.normal(k1, (2, 4, 16, 16), dtype=jnp.float32)
    residual = jax.random.normal(k2, (2, 4, 16, 16), dtype=jnp.float32)
    out = jax.block_until_ready(daf_forward(x, residual, min_pallas_elements=0))
    ref = x + residual
    assert out.shape == ref.shape and out.dtype == ref.dtype
    assert jnp.allclose(out, ref, atol=1e-6, rtol=1e-6)

    # 2) bf16 tensor exercising the tiled, 2-step (megacore-split) grid and the
    #    native promoted-dtype add.
    xb = jax.random.normal(k3, (4, 64, 32, 32), dtype=jnp.bfloat16)
    rb = jax.random.normal(k4, (4, 64, 32, 32), dtype=jnp.bfloat16)
    outb = jax.block_until_ready(daf_forward(xb, rb, min_pallas_elements=0))
    refb = xb + rb
    assert outb.dtype == refb.dtype
    assert jnp.allclose(outb.astype(jnp.float32), refb.astype(jnp.float32),
                        atol=1e-2, rtol=1e-2)

    # 3) Odd element count -> exercises the roofline XLA fallback path.
    k5, k6 = jax.random.split(jax.random.PRNGKey(1))
    xo = jax.random.normal(k5, (3, 5, 7, 11), dtype=jnp.float32)
    ro = jax.random.normal(k6, (3, 5, 7, 11), dtype=jnp.float32)
    outo = jax.block_until_ready(daf_forward(xo, ro, min_pallas_elements=0))
    assert jnp.allclose(outo, xo + ro, atol=1e-6, rtol=1e-6)

    print("KERNEL_OK")
</pallas_src>

<mosaic_0001>
module attributes {stable_mosaic.version = 11 : i64} {
  func.func @_daf_add_kernel(%arg0: i32, %arg1: memref<2x1024xf32, #tpu.memory_space<vmem>>, %arg2: memref<2x1024xf32, #tpu.memory_space<vmem>>, %arg3: memref<2x1024xf32, #tpu.memory_space<vmem>>) attributes {dimension_semantics = [#tpu.dimension_semantics<parallel>], iteration_bounds = array<i64: 1>, scalar_prefetch = 0 : i64, scratch_operands = 0 : i64, tpu.core_type = #tpu.core_type<tc>, window_params = [{transform_indices = @transform_0, window_bounds = array<i64: 2, 1024>}, {transform_indices = @transform_1, window_bounds = array<i64: 2, 1024>}, {transform_indices = @transform_2, window_bounds = array<i64: 2, 1024>}]} {
    %c0 = arith.constant 0 : index
    %c0_0 = arith.constant 0 : index
    %0 = vector.load %arg1[%c0, %c0_0] : memref<2x1024xf32, #tpu.memory_space<vmem>>, vector<2x1024xf32>
    %c0_1 = arith.constant 0 : index
    %c0_2 = arith.constant 0 : index
    %1 = vector.load %arg2[%c0_1, %c0_2] : memref<2x1024xf32, #tpu.memory_space<vmem>>, vector<2x1024xf32>
    %2 = arith.addf %0, %1 : vector<2x1024xf32>
    %c0_3 = arith.constant 0 : index
    %c0_4 = arith.constant 0 : index
    %3 = vector.load %arg3[%c0_3, %c0_4] : memref<2x1024xf32, #tpu.memory_space<vmem>>, vector<2x1024xf32>
    tpu.vector_store %arg3[%c0_3, %c0_4], %2 {strides = array<i32>} : memref<2x1024xf32, #tpu.memory_space<vmem>>, vector<2x1024xf32>,
    return
  }
  func.func @transform_0(%arg0: i32) -> (i32, i32) {
    %c0_i32 = arith.constant 0 : i32
    %c0_i32_0 = arith.constant 0 : i32
    return %arg0, %c0_i32 : i32, i32
  }
  func.func @transform_1(%arg0: i32) -> (i32, i32) {
    %c0_i32 = arith.constant 0 : i32
    %c0_i32_0 = arith.constant 0 : i32
    return %arg0, %c0_i32 : i32, i32
  }
  func.func @transform_2(%arg0: i32) -> (i32, i32) {
    %c0_i32 = arith.constant 0 : i32
    %c0_i32_0 = arith.constant 0 : i32
    return %arg0, %c0_i32 : i32, i32
  }
}

</mosaic_0001>

<bundles_post_ra>
// kernel: tpu_custom_call.1
= control target key start
LH: loop header
LB: loop body
LE: loop exit
PB: predicated region body
PF: predicated region fallthrough
CT: control target
= control target key end

     0   :  { %7 = vsyncpa [#allocation3], 0  ;;  %s174_s0 = inlined_call_operand.hbm [shape: f32[2,1024], index: 0, kind: input, shape index: {}]   ;;  %s175_s1 = inlined_call_operand.hbm [shape: f32[2,1024], index: 1, kind: input, shape index: {}]   ;;  %s176_s2 = inlined_call_operand.hbm [shape: f32[2,1024], index: 2, kind: output, shape index: {}]  }
   0x1   :  { %8 = vsyncpa [#allocation6], 0 }
   0x2   :  { %9 = vsyncpa [#allocation4], 0  ;;  %s15_s11 = sshll.u32 %s174_s0, 4  ;;  %s147_s12 = smov [#allocation2]   ;;  %s16_s11 = int_to_ptr.hbm [resolvable:$true] %s15_s11 }
   0x3   :  { %s17_s13 = sshll.u32 %s147_s12, 4  ;;  %s26_s16 = sshll.u32 %s175_s1, 4  ;;  %s18_s13 = int_to_ptr.vmem [resolvable:$true] %s17_s13  ;;  %s27_s16 = int_to_ptr.hbm [resolvable:$true] %s26_s16 }
   0x4   :  { %20 = dma.hbm_to_vmem [thread:$0]  %s16_s11, 256, %s18_s13, [#allocation3]  }
   0x5   :  { %s148_s17 = smov [#allocation5]  }
   0x6   :  { %s28_s18 = sshll.u32 %s148_s17, 4  ;;  %s29_s18 = int_to_ptr.vmem [resolvable:$true] %s28_s18 }
   0x7   :  { %31 = dma.hbm_to_vmem [thread:$0]  %s27_s16, 256, %s29_s18, [#allocation6]  }
   0x8   :  { %141 = dma.done.wait [#allocation3], 256  }
   0x9   :  { %142 = vsyncadd [#allocation3], 4294967040 }
   0xa   :  { %143 = dma.done.wait [#allocation6], 256  }
   0xb   :  { %144 = vsyncadd [#allocation6], 4294967040  ;;  %s149_s19 = smov [#allocation7]   ;;  %s55_s22 = sshll.u32 %s176_s2, 4  ;;  %v40_v0 = vld [vmem:[#allocation2] sm:$0xff]  ;;  %v42_v1 = vld [vmem:[#allocation5] sm:$0xff]  ;;  %s56_s22 = int_to_ptr.hbm [resolvable:$true] %s55_s22 }
   0xc   :  { %s53_s0 = sshll.u32 %s149_s19, 4  ;;  %v41_v2 = vld [vmem:[#allocation2 + $0x8] sm:$0xff]  ;;  %v44_v3 = vadd.f32 %v42_v1, %v40_v0  ;;  %v43_v4 = vld [vmem:[#allocation5 + $0x8] sm:$0xff]  ;;  %s54_s0 = int_to_ptr.vmem [resolvable:$true] %s53_s0 }
   0xd   :  { %v45_v5 = vadd.f32 %v43_v4, %v41_v2 }
   0xe   :  { %46 = vst [vmem:[#allocation7] sm:$0xff] %v44_v3 }
   0xf   :  { %47 = vst [vmem:[#allocation7 + $0x8] sm:$0xff] %v45_v5 }
  0x10   :  { %58 = dma.vmem_to_hbm [thread:$0]  %s54_s0, 256, %s56_s22, [#allocation4]  }
  0x11   :  { %145 = dma.done.wait [#allocation4], 256  }
  0x12   :  { %146 = vsyncadd [#allocation4], 4294967040 }
  0x13   :  { %63 = vsyncpa [#allocation3], 1 }
  0x14   :  { %64 = vsyncpa [#allocation6], 1 }
  0x15   :  { %65 = vsyncpa [#allocation4], 1 }

</bundles_post_ra>
